<compile_context>
chip_gen: v5e
topology: v5e:2x2
jax: 0.10.0
libtpu: 0.0.40
codegen_flags: <defaults>
</compile_context>

<pallas_src>
import math

import jax
import jax.numpy as jnp
from jax.experimental import pallas as pl
from jax.experimental.pallas import tpu as pltpu


# --------------------------------------------------------------------------- #
# Kernels
# --------------------------------------------------------------------------- #
def style_linear_kernel(style_ref, w_t_ref, bias_ref, out_ref):
    # style_ref: (N, S)   w_t_ref: (S, 2C)   bias_ref: (1, 2C)   out_ref: (N, 2C)
    out_ref[...] = (jnp.dot(style_ref[...], w_t_ref[...],
                            preferred_element_type=jnp.float32)
                    + bias_ref[...])


def film_kernel(gamma_ref, beta_ref, x_ref, out_ref):
    # gamma_ref / beta_ref: (tr, 1) f32 columns (broadcast over the lane axis)
    # x_ref / out_ref     : (tr, thw) activation tile in its native dtype
    x = x_ref[...].astype(jnp.float32)
    out_ref[...] = (gamma_ref[...] * x + beta_ref[...]).astype(out_ref.dtype)


# --------------------------------------------------------------------------- #
# Tiling helpers
# --------------------------------------------------------------------------- #
def _round_up(x, m):
    return ((x + m - 1) // m) * m


def _divisors_mult(n, m):
    """Divisors of n that are multiples of m, descending (assumes n % m == 0)."""
    return [d for d in range(n, m - 1, -m) if n % d == 0]


def _pick_tiles(rows, hw, itemsize, budget_bytes=24 << 20):
    """Largest (tr, thw) sublane x lane tiles whose double-buffered in/out
    activation blocks plus the gamma/beta columns fit the VMEM budget.
    `hw` must already be a multiple of 128."""
    lane_opts = _divisors_mult(hw, 128)
    row_opts = _divisors_mult(rows, 8) if rows % 8 == 0 else [rows]

    def fits(tr, thw):
        act = 2 * 2 * tr * thw * itemsize          # in + out, double-buffered
        cols = 2 * 2 * tr * 128 * 4                # gamma + beta (lane-padded f32)
        return act + cols <= budget_bytes

    for thw in lane_opts:                          # lane-density / big DMAs first
        for tr in row_opts:
            if fits(tr, thw):
                return tr, thw
    return row_opts[-1], lane_opts[-1]


# --------------------------------------------------------------------------- #
# Wrapper
# --------------------------------------------------------------------------- #
def adaptive_layer(x_nchw, style, weight, bias):
    """
    x_nchw : (N, C, H, W)  activations (dtype preserved end-to-end)
    style  : (N, S)
    weight : (2C, S)       PyTorch nn.Linear layout (out_features, in_features)
    bias   : (2C,)
    """
    N, C, H, W = x_nchw.shape
    S = style.shape[1]
    HW = H * W
    rows = N * C
    itemsize = jnp.dtype(x_nchw.dtype).itemsize

    # ---- 1) style linear: single tiny block, executed once (not per tile) ----
    gb = pl.pallas_call(
        style_linear_kernel,
        out_shape=jax.ShapeDtypeStruct((N, 2 * C), jnp.float32),
    )(style.astype(jnp.float32),
      weight.astype(jnp.float32).T,                 # (S, 2C)
      bias.astype(jnp.float32).reshape(1, 2 * C))

    gamma = gb[:, :C].reshape(rows, 1)              # one f32 column per activation row
    beta = gb[:, C:].reshape(rows, 1)

    # ---- 2) FiLM: stream x as (N*C, HW) in its native dtype ------------------
    x = x_nchw.reshape(rows, HW)
    hw_pad = _round_up(HW, 128)
    if hw_pad != HW:
        # TODO(synk): for HW far from a 128 multiple, folding (N*C*H, W) rows can
        # beat lane padding; the padded path keeps every store unmasked.
        x = jnp.pad(x, ((0, 0), (0, hw_pad - HW)))

    tr, thw = _pick_tiles(rows, hw_pad, itemsize)
    grid = (rows // tr, hw_pad // thw)

    flops = 2 * rows * hw_pad                       # one mul + one add per element
    bytes_accessed = 2 * rows * hw_pad * itemsize + 2 * rows * 4

    out = pl.pallas_call(
        film_kernel,
        out_shape=jax.ShapeDtypeStruct((rows, hw_pad), x_nchw.dtype),
        grid_spec=pltpu.PrefetchScalarGridSpec(
            num_scalar_prefetch=0,
            grid=grid,
            in_specs=[
                pl.BlockSpec((tr, 1), lambda i, j: (i, 0)),      # gamma column
                pl.BlockSpec((tr, 1), lambda i, j: (i, 0)),      # beta column
                pl.BlockSpec((tr, thw), lambda i, j: (i, j)),    # activation tile
            ],
            out_specs=pl.BlockSpec((tr, thw), lambda i, j: (i, j)),
        ),
        compiler_params=pltpu.CompilerParams(
            dimension_semantics=("parallel", "parallel"),
            vmem_limit_bytes=32 * 1024 * 1024),
        cost_estimate=pl.CostEstimate(flops=flops, transcendentals=0,
                                      bytes_accessed=bytes_accessed),
    )(gamma, beta, x)

    if hw_pad != HW:
        out = out[:, :HW]
    return out.reshape(N, C, H, W)


# --------------------------------------------------------------------------- #
# Pure-JAX reference (matches the PyTorch AdaptiveLayer semantics)
# --------------------------------------------------------------------------- #
def reference_forward(x_nchw, style, weight, bias):
    x = x_nchw.astype(jnp.float32)
    s = style.astype(jnp.float32) @ weight.astype(jnp.float32).T \
        + bias.astype(jnp.float32)                  # (N, 2C)
    C = x_nchw.shape[1]
    gamma = s[:, :C][:, :, None, None]
    beta = s[:, C:][:, :, None, None]
    return gamma * x + beta


if __name__ == "__main__":
    N, C, H, W, S = 2, 4, 16, 16, 8
    key = jax.random.PRNGKey(0)
    k1, k2, k3 = jax.random.split(key, 3)

    # PyTorch nn.Linear default weight init: U(-1/sqrt(fan_in), 1/sqrt(fan_in));
    # AdaptiveLayer.__init__ then sets bias[:C] = 1, bias[C:] = 0.
    bound = 1.0 / math.sqrt(S)
    weight = jax.random.uniform(k1, (2 * C, S), jnp.float32, -bound, bound)
    bias = jnp.concatenate([jnp.ones((C,), jnp.float32),
                            jnp.zeros((C,), jnp.float32)])

    x = jax.random.normal(k2, (N, C, H, W), jnp.float32)
    style = jax.random.normal(k3, (N, S), jnp.float32)

    out = jax.block_until_ready(adaptive_layer(x, style, weight, bias))
    ref = jax.block_until_ready(reference_forward(x, style, weight, bias))

    max_err = float(jnp.max(jnp.abs(out.astype(jnp.float32) - ref)))
    assert out.shape == x.shape and out.dtype == x.dtype
    assert max_err < 1e-4, f"mismatch vs reference: {max_err}"

    print("KERNEL_OK")
</pallas_src>

<mosaic_0001>
module attributes {stable_mosaic.version = 11 : i64} {
  func.func @style_linear_kernel(%arg0: memref<2x8xf32, #tpu.memory_space<vmem>>, %arg1: memref<8x8xf32, #tpu.memory_space<vmem>>, %arg2: memref<1x8xf32, #tpu.memory_space<vmem>>, %arg3: memref<2x8xf32, #tpu.memory_space<vmem>>) attributes {dimension_semantics = [], scalar_prefetch = 0 : i64, scratch_operands = 0 : i64, tpu.core_type = #tpu.core_type<tc>} {
    %c0 = arith.constant 0 : index
    %c0_0 = arith.constant 0 : index
    %0 = vector.load %arg0[%c0, %c0_0] : memref<2x8xf32, #tpu.memory_space<vmem>>, vector<2x8xf32>
    %c0_1 = arith.constant 0 : index
    %c0_2 = arith.constant 0 : index
    %1 = vector.load %arg1[%c0_1, %c0_2] : memref<8x8xf32, #tpu.memory_space<vmem>>, vector<8x8xf32>
    %cst = arith.constant dense<0.000000e+00> : vector<2x8xf32>
    %2 = tpu.matmul %0, %1, %cst {dimension_numbers = #tpu.dot_dimension_numbers<[1], [0], [0], [1], [0, 0, 1, 1], [], []>} : vector<2x8xf32>, vector<8x8xf32>, vector<2x8xf32> -> vector<2x8xf32>
    %c0_3 = arith.constant 0 : index
    %c0_4 = arith.constant 0 : index
    %3 = vector.load %arg2[%c0_3, %c0_4] : memref<1x8xf32, #tpu.memory_space<vmem>>, vector<1x8xf32>
    %4 = vector.broadcast %3 : vector<1x8xf32> to vector<2x8xf32>
    %5 = arith.addf %2, %4 : vector<2x8xf32>
    %c0_5 = arith.constant 0 : index
    %c0_6 = arith.constant 0 : index
    %6 = vector.load %arg3[%c0_5, %c0_6] : memref<2x8xf32, #tpu.memory_space<vmem>>, vector<2x8xf32>
    tpu.vector_store %arg3[%c0_5, %c0_6], %5 {strides = array<i32>} : memref<2x8xf32, #tpu.memory_space<vmem>>, vector<2x8xf32>,
    return
  }
}

</mosaic_0001>

<bundles_post_ra>
// kernel: tpu_custom_call.1
= control target key start
LH: loop header
LB: loop body
LE: loop exit
PB: predicated region body
PF: predicated region fallthrough
CT: control target
= control target key end

     0   :  { %8 = vsyncpa [#allocation3], 0  ;;  %s211_s0 = inlined_call_operand.hbm [shape: f32[2,8], index: 0, kind: input, shape index: {}]   ;;  %s212_s1 = inlined_call_operand.hbm [shape: f32[8,8], index: 1, kind: input, shape index: {}]   ;;  %s213_s2 = inlined_call_operand.vmem [shape: f32[1,8], index: 2, kind: input, shape index: {}]   ;;  %s214_s3 = inlined_call_operand.hbm [shape: f32[2,8], index: 3, kind: output, shape index: {}]  }
   0x1   :  { %9 = vsyncpa [#allocation6], 0 }
   0x2   :  { %10 = vsyncpa [#allocation4], 0  ;;  %s16_s14 = sshll.u32 %s211_s0, 4  ;;  %s176_s15 = smov [#allocation2]   ;;  %s17_s14 = int_to_ptr.hbm [resolvable:$true] %s16_s14 }
   0x3   :  { %s18_s16 = sshll.u32 %s176_s15, 4  ;;  %s27_s19 = sshll.u32 %s212_s1, 4  ;;  %s19_s16 = int_to_ptr.vmem [resolvable:$true] %s18_s16  ;;  %s28_s19 = int_to_ptr.hbm [resolvable:$true] %s27_s19 }
   0x4   :  { %21 = dma.hbm_to_vmem [thread:$0]  %s17_s14, 32, %s19_s16, [#allocation3]  }
   0x5   :  { %s177_s20 = smov [#allocation5]  }
   0x6   :  { %s29_s21 = sshll.u32 %s177_s20, 4  ;;  %s30_s21 = int_to_ptr.vmem [resolvable:$true] %s29_s21 }
   0x7   :  { %32 = dma.hbm_to_vmem [thread:$0]  %s28_s19, 128, %s30_s21, [#allocation6]  }
   0x8   :  { %170 = dma.done.wait [#allocation3], 32  }
   0x9   :  { %171 = vsyncadd [#allocation3], 4294967264 }
   0xa   :  { %172 = dma.done.wait [#allocation6], 128  }
   0xb   :  { %173 = vsyncadd [#allocation6], 4294967168  ;;  %vm49_vm0 = vcmask 64512   ;;  %v44_v0 = vld [vmem:[#allocation5] sm:$0xff]  ;;  %v43_v1 = vld [vmem:[#allocation2] sm:$0x3] }
   0xc   :  { %68 = vmatpush.msra.mxu0 %v44_v0  ;;  %v97_v2 = vld [vmem:[%s213_s2] ss:$0 sm:$0xff]  ;;  %s178_s1 = smov [#allocation7]   ;;  %s82_s26 = sshll.u32 %s214_s3, 4  ;;  %vm73_vm1 = vcmask 58368   ;;  %s83_s26 = int_to_ptr.hbm [resolvable:$true] %s82_s26 }
   0xd   :  { %93 = vmatmul.msk.f32.vlgmr.msra.gmra.mxu0 %vm49_vm0, %v43_v1  ;;  %s80_s23 = sshll.u32 %s178_s1, 4  ;;  %s81_s23 = int_to_ptr.vmem [resolvable:$true] %s80_s23 }
  0x8a   :  { %v70_v3 = vpop.f32.mrf.mxu0 }
  0x8b   :  { %v71_v4 = vadd.f32 %v97_v2, %v70_v3 }
  0x8d   :  { %74 = vst.msk [vmem:[#allocation7] sm:$0x3] %vm73_vm1, %v71_v4 }
  0x8e   :  { %85 = dma.vmem_to_hbm [thread:$0]  %s81_s23, 32, %s83_s26, [#allocation4]  }
  0x8f   :  { %174 = dma.done.wait [#allocation4], 32  }
  0x90   :  { %175 = vsyncadd [#allocation4], 4294967264 }
  0x91   :  { %90 = vsyncpa [#allocation3], 1 }
  0x92   :  { %91 = vsyncpa [#allocation6], 1 }
  0x93   :  { %92 = vsyncpa [#allocation4], 1 }

</bundles_post_ra>
